<compile_context>
chip_gen: v7x
topology: tpu7x:2x2x1
jax: 0.10.0
libtpu: 0.0.40
codegen_flags: <defaults>
</compile_context>

<pallas_src>
import functools

import jax
import jax.numpy as jnp
import numpy as np
from jax.experimental import pallas as pl
from jax.experimental.pallas import tpu as pltpu


def _se_kernel(x_ref, w1t_ref, w2t_ref, o_ref, *, inv_hw):
    """Fused SE layer for a tile of Bt images.

    x_ref:   (Bt, C, HW)   input feature maps (channels x flattened spatial)
    w1t_ref: (C, Cred)     first Linear weight, pre-transposed (in x out)
    w2t_ref: (Cred, C)     second Linear weight, pre-transposed (in x out)
    o_ref:   (Bt, C, HW)   output = x * sigmoid(relu(mean_hw(x) @ W1^T) @ W2^T)
    """
    x = x_ref[...]                                               # (Bt, C, HW)
    # Global average pool over the spatial (lane) axis, accumulated in f32.
    pooled = jnp.sum(x.astype(jnp.float32), axis=-1) * inv_hw    # (Bt, C) f32
    # Image-batched SE MLP (f32 accumulation).
    h = jnp.dot(pooled, w1t_ref[...].astype(jnp.float32),
                preferred_element_type=jnp.float32)              # (Bt, Cred)
    h = jnp.maximum(h, 0.0)
    s = jnp.dot(h, w2t_ref[...].astype(jnp.float32),
                preferred_element_type=jnp.float32)              # (Bt, C)
    s = jax.nn.sigmoid(s)
    # Channel-wise rescale in the I/O dtype (bf16 stays bf16 on v6e/v7x; the
    # compiler upcasts per-vreg on v5e), broadcast over the lane (HW) axis.
    o_ref[...] = x * s.astype(x.dtype)[:, :, None]


def se_layer(x_nchw, w1, w2, *, inplace=False,
             vmem_budget_bytes=12 * 1024 * 1024):
    """SELayer forward.

    x_nchw: (B, C, H, W) in any float dtype (dtype is preserved end-to-end).
    w1:     (C//r, C)    first Linear weight (PyTorch out x in layout), no bias.
    w2:     (C, C//r)    second Linear weight, no bias.
    inplace: alias input 0 to output 0 (only if x is dead after this layer).
    """
    B, C, H, W = x_nchw.shape
    hw = H * W
    cred = w1.shape[0]
    # Free contiguous reshape: lane-dense minor dim = H*W (multiple of 128 for
    # the test shape); no transposes, no padding, dtype preserved.
    x3 = x_nchw.reshape(B, C, hw)
    # Pre-transpose the tiny weights once in the wrapper so the kernel runs
    # image-batched (Bt, C) @ (C, Cred) / (Bt, Cred) @ (Cred, C) matmuls.
    w1t = jnp.transpose(w1)                                      # (C, Cred)
    w2t = jnp.transpose(w2)                                      # (Cred, C)

    # --- Batch tiling: biggest divisor of B whose per-buffer block stays under
    # the VMEM budget (keeps double-buffering alive on v7x's 64 MiB VMEM).
    bytes_per_image = C * hw * x3.dtype.itemsize
    bt = B
    while bt > 1 and bt * bytes_per_image > vmem_budget_bytes:
        bt -= 1
        while B % bt:
            bt -= 1
    # TODO(synk): if a *single* image exceeds the budget (e.g. C=512, 56x56 in
    # f32), add a grid axis over HW (pl.when-initialized pooled-sum accumulator
    # + second rescale pass) instead of one monolithic block.
    grid = (B // bt,)
    block_bytes = bt * bytes_per_image
    # in + out, double-buffered, + weights + slack; capped at v7x physical VMEM.
    vmem_limit = min(64 * 1024 * 1024,
                     max(32 * 1024 * 1024, 5 * block_bytes + (1 << 20)))

    kernel = functools.partial(_se_kernel, inv_hw=1.0 / hw)
    out = pl.pallas_call(
        kernel,
        out_shape=jax.ShapeDtypeStruct((B, C, hw), x3.dtype),
        grid=grid,
        in_specs=[
            pl.BlockSpec((bt, C, hw), lambda i: (i, 0, 0)),   # Bt images / step
            pl.BlockSpec((C, cred), lambda i: (0, 0)),        # weights resident
            pl.BlockSpec((cred, C), lambda i: (0, 0)),
        ],
        out_specs=pl.BlockSpec((bt, C, hw), lambda i: (i, 0, 0)),
        input_output_aliases=({0: 0} if inplace else {}),
        compiler_params=pltpu.CompilerParams(
            dimension_semantics=("parallel",),
            vmem_limit_bytes=vmem_limit),
    )(x3, w1t, w2t)
    return out.reshape(B, C, H, W)


# --------------------------------------------------------------------------
# Pure-JAX reference (matches the PyTorch SELayer forward).
# --------------------------------------------------------------------------
def reference(x, w1, w2):
    y = jnp.mean(x, axis=(2, 3))                    # AdaptiveAvgPool2d(1) -> (B, C)
    h = jnp.maximum(y @ w1.T, 0.0)                  # Linear(C -> C/r), ReLU
    s = jax.nn.sigmoid(h @ w2.T)                    # Linear(C/r -> C), Sigmoid
    return x * s[:, :, None, None]


if __name__ == "__main__":
    key = jax.random.PRNGKey(0)
    k_x, k_w1, k_w2 = jax.random.split(key, 3)

    B, C, H, W = 2, 32, 16, 16
    reduction = 8
    cred = C // reduction                           # 4

    x = jax.random.normal(k_x, (B, C, H, W), jnp.float32)           # NCHW, like PyTorch
    w1 = 0.1 * jax.random.normal(k_w1, (cred, C), jnp.float32)      # Linear(C -> C/r), bias=False
    w2 = 0.1 * jax.random.normal(k_w2, (C, cred), jnp.float32)      # Linear(C/r -> C), bias=False

    # f32 path (matches PyTorch defaults), tight tolerance.
    out = jax.block_until_ready(se_layer(x, w1, w2))
    assert out.shape == (B, C, H, W), out.shape
    assert out.dtype == jnp.float32, out.dtype
    ref = reference(x, w1, w2)
    np.testing.assert_allclose(np.asarray(out), np.asarray(ref), rtol=1e-5, atol=1e-5)

    # bf16 I/O path: halves HBM bytes; pool sum + MLP still accumulate in f32.
    xb = x.astype(jnp.bfloat16)
    outb = jax.block_until_ready(se_layer(xb, w1, w2))
    assert outb.dtype == jnp.bfloat16, outb.dtype
    refb = reference(xb.astype(jnp.float32), w1, w2)
    np.testing.assert_allclose(np.asarray(outb, dtype=np.float32),
                               np.asarray(refb), rtol=2e-2, atol=2e-2)

    print("KERNEL_OK")
</pallas_src>

<mosaic_0001>
module attributes {stable_mosaic.version = 11 : i64} {
  func.func @_se_kernel(%arg0: i32, %arg1: memref<2x32x256xf32, #tpu.memory_space<vmem>>, %arg2: memref<32x4xf32, #tpu.memory_space<vmem>>, %arg3: memref<4x32xf32, #tpu.memory_space<vmem>>, %arg4: memref<2x32x256xf32, #tpu.memory_space<vmem>>) attributes {dimension_semantics = [#tpu.dimension_semantics<parallel>], iteration_bounds = array<i64: 1>, scalar_prefetch = 0 : i64, scratch_operands = 0 : i64, tpu.core_type = #tpu.core_type<tc>, window_params = [{transform_indices = @transform_0, window_bounds = array<i64: 2, 32, 256>}, {pipeline_mode = #tpu.pipeline_mode<synchronous>, transform_indices = @transform_1, window_bounds = array<i64: 32, 4>}, {pipeline_mode = #tpu.pipeline_mode<synchronous>, transform_indices = @transform_2, window_bounds = array<i64: 4, 32>}, {transform_indices = @transform_3, window_bounds = array<i64: 2, 32, 256>}]} {
    %c0 = arith.constant 0 : index
    %c0_0 = arith.constant 0 : index
    %c0_1 = arith.constant 0 : index
    %0 = vector.load %arg1[%c0, %c0_0, %c0_1] : memref<2x32x256xf32, #tpu.memory_space<vmem>>, vector<2x32x256xf32>
    %cst = arith.constant dense<0.000000e+00> : vector<2x32xf32>
    %1 = vector.multi_reduction <add>, %0, %cst [2] : vector<2x32x256xf32> to vector<2x32xf32>
    %cst_2 = arith.constant 3.906250e-03 : f32
    %2 = vector.broadcast %cst_2 : f32 to vector<2x32xf32>
    %3 = arith.mulf %1, %2 : vector<2x32xf32>
    %c0_3 = arith.constant 0 : index
    %c0_4 = arith.constant 0 : index
    %4 = vector.load %arg2[%c0_3, %c0_4] : memref<32x4xf32, #tpu.memory_space<vmem>>, vector<32x4xf32>
    %cst_5 = arith.constant dense<0.000000e+00> : vector<2x4xf32>
    %5 = tpu.matmul %3, %4, %cst_5 {dimension_numbers = #tpu.dot_dimension_numbers<[1], [0], [0], [1], [0, 0, 1, 1], [], []>} : vector<2x32xf32>, vector<32x4xf32>, vector<2x4xf32> -> vector<2x4xf32>
    %cst_6 = arith.constant 0.000000e+00 : f32
    %6 = vector.broadcast %cst_6 : f32 to vector<2x4xf32>
    %7 = arith.maximumf %5, %6 : vector<2x4xf32>
    %c0_7 = arith.constant 0 : index
    %c0_8 = arith.constant 0 : index
    %8 = vector.load %arg3[%c0_7, %c0_8] : memref<4x32xf32, #tpu.memory_space<vmem>>, vector<4x32xf32>
    %cst_9 = arith.constant dense<0.000000e+00> : vector<2x32xf32>
    %9 = tpu.matmul %7, %8, %cst_9 {dimension_numbers = #tpu.dot_dimension_numbers<[1], [0], [0], [1], [0, 0, 1, 1], [], []>} : vector<2x4xf32>, vector<4x32xf32>, vector<2x32xf32> -> vector<2x32xf32>
    %10 = arith.negf %9 : vector<2x32xf32>
    %11 = math.exp %10 : vector<2x32xf32>
    %cst_10 = arith.constant 1.000000e+00 : f32
    %12 = vector.broadcast %cst_10 : f32 to vector<2x32xf32>
    %13 = arith.addf %12, %11 : vector<2x32xf32>
    %14 = arith.divf %12, %13 : vector<2x32xf32>
    %15 = vector.shape_cast %14 : vector<2x32xf32> to vector<2x32x1xf32>
    %16 = vector.broadcast %15 : vector<2x32x1xf32> to vector<2x32x256xf32>
    %17 = arith.mulf %0, %16 : vector<2x32x256xf32>
    %c0_11 = arith.constant 0 : index
    %c0_12 = arith.constant 0 : index
    %c0_13 = arith.constant 0 : index
    %18 = vector.load %arg4[%c0_11, %c0_12, %c0_13] : memref<2x32x256xf32, #tpu.memory_space<vmem>>, vector<2x32x256xf32>
    tpu.vector_store %arg4[%c0_11, %c0_12, %c0_13], %17 {strides = array<i32>} : memref<2x32x256xf32, #tpu.memory_space<vmem>>, vector<2x32x256xf32>,
    return
  }
  func.func @transform_0(%arg0: i32) -> (i32, i32, i32) {
    %c0_i32 = arith.constant 0 : i32
    %c0_i32_0 = arith.constant 0 : i32
    %c0_i32_1 = arith.constant 0 : i32
    return %arg0, %c0_i32, %c0_i32_0 : i32, i32, i32
  }
  func.func @transform_1(%arg0: i32) -> (i32, i32) {
    %c0_i32 = arith.constant 0 : i32
    %c0_i32_0 = arith.constant 0 : i32
    %c0_i32_1 = arith.constant 0 : i32
    return %c0_i32, %c0_i32_0 : i32, i32
  }
  func.func @transform_2(%arg0: i32) -> (i32, i32) {
    %c0_i32 = arith.constant 0 : i32
    %c0_i32_0 = arith.constant 0 : i32
    %c0_i32_1 = arith.constant 0 : i32
    return %c0_i32, %c0_i32_0 : i32, i32
  }
  func.func @transform_3(%arg0: i32) -> (i32, i32, i32) {
    %c0_i32 = arith.constant 0 : i32
    %c0_i32_0 = arith.constant 0 : i32
    %c0_i32_1 = arith.constant 0 : i32
    return %arg0, %c0_i32, %c0_i32_0 : i32, i32, i32
  }
}

</mosaic_0001>

<bundles_post_ra>
// kernel: tpu_custom_call.1
= control target key start
LH: loop header
LB: loop body
LE: loop exit
PB: predicated region body
PF: predicated region fallthrough
CT: control target
= control target key end

     0   :  { %8 = vsyncpa [#allocation3], 0  ;;  %s611_s0 = inlined_call_operand.hbm [shape: f32[2,32,256], index: 0, kind: input, shape index: {}]   ;;  %s612_s1 = inlined_call_operand.vmem [shape: f32[32,4], index: 1, kind: input, shape index: {}]   ;;  %s613_s2 = inlined_call_operand.vmem [shape: f32[4,32], index: 2, kind: input, shape index: {}]   ;;  %s614_s3 = inlined_call_operand.hbm [shape: f32[2,32,256], index: 3, kind: output, shape index: {}]  }
   0x1   :  { %9 = vsyncpa [#allocation4], 0  ;;  %s475_s12 = smov [#allocation2]   ;;  %s427_s16 = scalar_lea.hbm %s611_s0, 2048 }
   0x2   :  { %s15_s13 = sshll.u32 %s475_s12, 4  ;;  %p428_p0 = scmp.ne.s32.totalorder %s611_s0, %s427_s16  ;;  %s16_s13 = int_to_ptr.vmem [resolvable:$true] %s15_s13 }
   0x3   :  { %p431_p1 = scmp.lt.u32.totalorder %s427_s16, %s611_s0 }
   0x5   :  { %p433_p2 = pnand %p431_p1, %p428_p0 }
   0x7   :  { %436 = shalt.err (!%p433_p2)
}
   0x8   :  { %s437_s21 = scalar_lea.vmem %s16_s13, 2048  ;;  %p442_p4 = scmp.lt.s32.totalorder %s16_s13, %s16_s13 }
   0x9   :  { %p438_p3 = scmp.ne.s32.totalorder %s16_s13, %s437_s21  ;;  %p443_p5 = scmp.lt.s32.totalorder %s437_s21, %s437_s21 }
   0xb   :  { %p444_p6 = por %p443_p5, %p442_p4 }
   0xd   :  { %p445_p7 = pnand %p444_p6, %p438_p3 }
   0xf   :  { %448 = shalt.err (!%p445_p7)
}
  0x10   :  { %s476_s22 = smov 256   ;;  %s477_s23 = smov 16  }
  0x11   :  { %21 = dma.hbm_to_vmem [thread:$0]  %s611_s0, 2048, %s16_s13, [#allocation3], %s476_s22, %s476_s22, %s477_s23  }
  0x12   :  { %471 = dma.done.wait [#allocation3], 2048  }
  0x13   :  { %472 = vsyncadd [#allocation3], 4294965248  ;;  %v517_v0 = vld [vmem:[#allocation2 + $0x40] sm:$0xff]  ;;  %v519_v1 = vld [vmem:[#allocation2 + $0x48] sm:$0xff]  ;;  %v478_v27 = vmov 0.0|0.0   ;;  %vm479_vm0 = vmmov 0   ;;  %v89_v32 = vlaneseq }
  0x14   :  { %v521_v2 = vld [vmem:[#allocation2] sm:$0xff]  ;;  %v57_v3 = vadd.f32 %v519_v1, %v517_v0  ;;  %v525_v4 = vld [vmem:[#allocation2 + $0x8] sm:$0xff]  ;;  %v527_v5 = vld [vmem:[#allocation2 + $0x50] sm:$0xff]  ;;  %410 = vmatprep.subr.bf16.mxu0 %v478_v27  ;;  %v480_v31 = vmov 0.0   ;;  %vm100_vm1 = vcmask 130112   ;;  %vm107_vm2 = vcmask 195712  }
  0x15   :  { %v529_v6 = vld [vmem:[#allocation2 + $0x58] sm:$0xff]  ;;  %v45_v7 = vadd.f32 %v525_v4, %v521_v2  ;;  %v533_v8 = vld [vmem:[#allocation2 + $0x10] sm:$0xff]  ;;  %v541_v12 = vld [vmem:[#allocation2 + $0x60] sm:$0xff]  ;;  %402 = vmatprep.mubr.msk.f32.mxu0 %vm479_vm0, %v480_v31  ;;  %405 = vmatprep.subr.mxu1 %v480_v31  ;;  %v90_v34 = vand.u32 127, %v89_v32  ;;  %v92_v39 = vshrl.u32 %v89_v32, 7  ;;  %vm114_vm3 = vcmask 261312  }
  0x16   :  { %v535_v9 = vld [vmem:[#allocation2 + $0x18] sm:$0xff]  ;;  %58 = vadd.xlane.f32.xlu1 %v57_v3  ;;  %v60_v10 = vadd.f32 %v529_v6, %v527_v5  ;;  %v543_v13 = vld [vmem:[#allocation2 + $0x68] sm:$0xff]  ;;  %v545_v14 = vld [vmem:[#allocation2 + $0x20] sm:$0xff]  ;;  %407 = vmatprep.mubr.msk.f32.mxu1 %vm479_vm0, %v480_v31  ;;  %vm135_vm4 = vcmask 1041409   ;;  %vm137_vm5 = vcmask 261120   ;;  %vm216_vm6 = vcmask 1043456  }
  0x17   :  { %46 = vadd.xlane.f32.xlu0 %v45_v7  ;;  %v48_v11 = vadd.f32 %v535_v9, %v533_v8  ;;  %v547_v15 = vld [vmem:[#allocation2 + $0x28] sm:$0xff]  ;;  %v63_v16 = vadd.f32 %v543_v13, %v541_v12  ;;  %v553_v18 = vld [vmem:[#allocation2 + $0x70] sm:$0xff]  ;;  %v555_v19 = vld [vmem:[#allocation2 + $0x78] sm:$0xff]  ;;  %v95_v36 = vadd.s32 4294967288, %v90_v34  ;;  %v102_v38 = vadd.s32 4294967280, %v90_v34 }
  0x18   :  { %v51_v17 = vadd.f32 %v547_v15, %v545_v14  ;;  %v557_v20 = vld [vmem:[#allocation2 + $0x30] sm:$0xff]  ;;  %v559_v21 = vld [vmem:[#allocation2 + $0x38] sm:$0xff]  ;;  %v66_v22 = vadd.f32 %v555_v19, %v553_v18  ;;  %v77_v24 = vld [vmem:[%s612_s1] sm:$0xff]  ;;  %v109_v43 = vadd.s32 4294967272, %v90_v34  ;;  %v93_v47 = vsub.s32 %v90_v34, %v92_v39 }
  0x19   :  { %v54_v23 = vadd.f32 %v559_v21, %v557_v20  ;;  %v78_v25 = vld [vmem:[%s612_s1 + $0x8] sm:$0xff]  ;;  %v79_v28 = vld [vmem:[%s612_s1 + $0x10] sm:$0xff]  ;;  %v80_v29 = vld [vmem:[%s612_s1 + $0x18] sm:$0xff]  ;;  %v98_v41 = vsub.s32 %v95_v36, %v92_v39  ;;  %v105_v45 = vsub.s32 %v102_v38, %v92_v39  ;;  %vm212_vm7 = vcmask 31744  }
  0x1a   :  { %61 = vadd.xlane.f32.xlu1 %v60_v10  ;;  %v411_v26 = vpack.c.bf16 %v78_v25, %v77_v24  ;;  %v414_v30 = vpack.c.bf16 %v80_v29, %v79_v28  ;;  %v112_v54 = vsub.s32 %v109_v43, %v92_v39  ;;  %v211_v25 = vld [vmem:[%s613_s2] sm:$0xf]  ;;  %v298_v34 = vsub.s32 0, %v92_v39  ;;  %s481_s2 = smov [#allocation5]  }
  0x1b   :  { %49 = vadd.xlane.f32.xlu0 %v48_v11  ;;  %406 = vmatpush3.msk.msra.mxu1 %vm216_vm6, %v211_v25  ;;  %s371_s7 = sshll.u32 %s481_s2, 4  ;;  %s372_s7 = int_to_ptr.vmem [resolvable:$true] %s371_s7 }
  0x1c   :  { %412 = vmatpush3.bf16.msra.mxu0 %v411_v26  ;;  %s449_s8 = scalar_lea.vmem %s372_s7, 2048  ;;  %p454_p9 = scmp.lt.s32.totalorder %s372_s7, %s372_s7 }
  0x1d   :  { %413 = vmatprep.subr.bf16.mxu0 %v478_v27  ;;  %p450_p8 = scmp.ne.s32.totalorder %s372_s7, %s449_s8  ;;  %p455_p10 = scmp.lt.s32.totalorder %s449_s8, %s449_s8 }
  0x1e   :  { %64 = vadd.xlane.f32.xlu1 %v63_v16 }
  0x1f   :  { %52 = vadd.xlane.f32.xlu0 %v51_v17  ;;  %p456_p11 = por %p455_p10, %p454_p9 }
  0x20   :  { %415 = vmatpush3.bf16.msra.mxu0 %v414_v30 }
  0x21   :  { %p457_p12 = pnand %p456_p11, %p450_p8 }
  0x22   :  { %67 = vadd.xlane.f32.xlu1 %v66_v22 }
  0x23   :  { %55 = vadd.xlane.f32.xlu0 %v54_v23 }
  0xa3   :  { %v59_v33 = vpop.xlane.xlu1 %58 }
  0xa4   :  { %v47_v35 = vpop.xlane.xlu0 %46  ;;  %v73_v48 = vmul.f32 0.00390625, %v59_v33 }
  0xa5   :  { %v69_v51 = vmul.f32 0.00390625, %v47_v35 }
  0xa6   :  { %v119_v58 = vrot.slane %v73_v48, %v93_v47 }
  0xa7   :  { %v62_v37 = vpop.xlane.xlu1 %61  ;;  %v94_v62 = vrot.slane %v69_v51, %v93_v47 }
  0xa8   :  { %v50_v40 = vpop.xlane.xlu0 %49  ;;  %v74_v42 = vmul.f32 0.00390625, %v62_v37  ;;  %v317_v37 = vsub.s32 1, %v92_v39 }
  0xa9   :  { %v70_v44 = vmul.f32 0.00390625, %v50_v40 }
  0xaa   :  { %v123_v53 = vrot.slane %v74_v42, %v98_v41 }
  0xab   :  { %v65_v46 = vpop.xlane.xlu1 %64  ;;  %v99_v55 = vrot.slane %v70_v44, %v98_v41 }
  0xac   :  { %v75_v49 = vmul.f32 0.00390625, %v65_v46  ;;  %v53_v50 = vpop.xlane.xlu0 %52  ;;  %v124_v3 = vsel %vm100_vm1, %v123_v53, %v119_v58 }
  0xad   :  { %v71_v52 = vmul.f32 0.00390625, %v53_v50  ;;  %v101_v10 = vsel %vm100_vm1, %v99_v55, %v94_v62 }
  0xae   :  { %v128_v56 = vrot.slane %v75_v49, %v105_v45 }
  0xaf   :  { %v68_v57 = vpop.xlane.xlu1 %67  ;;  %v106_v59 = vrot.slane %v71_v52, %v105_v45 }
  0xb0   :  { %v76_v60 = vmul.f32 0.00390625, %v68_v57  ;;  %v56_v61 = vpop.xlane.xlu0 %55  ;;  %v129_v11 = vsel %vm107_vm2, %v128_v56, %v124_v3 }
  0xb1   :  { %v72_v63 = vmul.f32 0.00390625, %v56_v61  ;;  %v108_v17 = vsel %vm107_vm2, %v106_v59, %v101_v10 }
  0xb2   :  { %v133_v7 = vrot.slane %v76_v60, %v112_v54 }
  0xb3   :  { %v113_v16 = vrot.slane %v72_v63, %v112_v54 }
  0xb4   :  { %v134_v22 = vsel %vm114_vm3, %v133_v7, %v129_v11 }
  0xb5   :  { %v115_v23 = vsel %vm114_vm3, %v113_v16, %v108_v17 }
  0xb6   :  { %v136_v24 = vsel %vm135_vm4, %v134_v22, %v115_v23 }
  0xb7   :  { %403 = vmatmul.mubr.msk.f32.vlgmr.msra.gmra.mrb[0].mxu0 %vm137_vm5, %v136_v24 }
 0x18a   :  { %v206_v26 = vpop.f32.mrb[0].mxu0 }
 0x18b   :  { %v210_v27 = vmax.f32 %v206_v26, 0.0  ;;  %v404_v28 = vpop.f32.mrb[1].mxu0 }
 0x18d   :  { %408 = vmatmul.mubr.msk.f32.vlgmr.msra.gmra.mrb[0].mxu1 %vm212_vm7, %v210_v27 }
 0x260   :  { %v286_v29 = vpop.f32.mrb[0].mxu1 }
 0x261   :  { %v386_v30 = vmul.f32 -1.442695, %v286_v29  ;;  %v409_v31 = vpop.f32.mrb[1].mxu1 }
 0x263   :  { %423 = vpow2.f32 %v386_v30 }
 0x26d   :  { %v424_v32 = vpop.eup %423 }
 0x26e   :  { %v293_v33 = vadd.f32 1.0, %v424_v32 }
 0x270   :  { %425 = vrcp.f32 %v293_v33 }
 0x27a   :  { %v426_v35 = vpop.eup %425 }
 0x27b   :  { %v299_v36 = vrot.slane %v426_v35, %v298_v34  ;;  %v318_v38 = vrot.slane %v426_v35, %v317_v37 }
 0x27d   :  { %305 = vbcast.lane.b32.xlu1 %v299_v36, 264  ;;  %301 = vbcast.lane.b32.xlu0 %v299_v36, 256 }
 0x281   :  { %309 = vbcast.lane.b32.xlu1 %v299_v36, 272  ;;  %320 = vbcast.lane.b32.xlu0 %v318_v38, 256 }
 0x285   :  { %313 = vbcast.lane.b32.xlu1 %v299_v36, 280  ;;  %328 = vbcast.lane.b32.xlu0 %v318_v38, 272 }
 0x289   :  { %324 = vbcast.lane.b32.xlu1 %v318_v38, 264 }
 0x28d   :  { %332 = vbcast.lane.b32.xlu1 %v318_v38, 280 }
 0x2ef   :  { %v306_v40 = vpop.permute.xlu1 %305  ;;  %v302_v41 = vpop.permute.xlu0 %301 }
 0x2f0   :  { %v336_v42 = vmul.f32 %v306_v40, %v533_v8  ;;  %v337_v43 = vmul.f32 %v306_v40, %v535_v9  ;;  %v334_v44 = vmul.f32 %v302_v41, %v521_v2  ;;  %v335_v45 = vmul.f32 %v302_v41, %v525_v4 }
 0x2f2   :  { %352 = vst [vmem:[#allocation5 + $0x10] sm:$0xff] %v336_v42  ;;  %353 = vst [vmem:[#allocation5 + $0x18] sm:$0xff] %v337_v43 }
 0x2f3   :  { %350 = vst [vmem:[#allocation5] sm:$0xff] %v334_v44  ;;  %351 = vst [vmem:[#allocation5 + $0x8] sm:$0xff] %v335_v45  ;;  %v310_v39 = vpop.permute.xlu1 %309  ;;  %v321_v46 = vpop.permute.xlu0 %320 }
 0x2f4   :  { %v338_v47 = vmul.f32 %v310_v39, %v545_v14  ;;  %v339_v48 = vmul.f32 %v310_v39, %v547_v15  ;;  %v342_v49 = vmul.f32 %v321_v46, %v517_v0  ;;  %v343_v8 = vmul.f32 %v321_v46, %v519_v1 }
 0x2f6   :  { %354 = vst [vmem:[#allocation5 + $0x20] sm:$0xff] %v338_v47  ;;  %355 = vst [vmem:[#allocation5 + $0x28] sm:$0xff] %v339_v48 }
 0x2f7   :  { %358 = vst [vmem:[#allocation5 + $0x40] sm:$0xff] %v342_v49  ;;  %359 = vst [vmem:[#allocation5 + $0x48] sm:$0xff] %v343_v8  ;;  %v314_v2 = vpop.permute.xlu1 %313  ;;  %v329_v4 = vpop.permute.xlu0 %328 }
 0x2f8   :  { %v340_v9 = vmul.f32 %v314_v2, %v557_v20  ;;  %v341_v50 = vmul.f32 %v314_v2, %v559_v21  ;;  %v346_v51 = vmul.f32 %v329_v4, %v541_v12  ;;  %v347_v14 = vmul.f32 %v329_v4, %v543_v13 }
 0x2fa   :  { %356 = vst [vmem:[#allocation5 + $0x30] sm:$0xff] %v340_v9  ;;  %357 = vst [vmem:[#allocation5 + $0x38] sm:$0xff] %v341_v50 }
 0x2fb   :  { %362 = vst [vmem:[#allocation5 + $0x60] sm:$0xff] %v346_v51  ;;  %363 = vst [vmem:[#allocation5 + $0x68] sm:$0xff] %v347_v14  ;;  %v325_v0 = vpop.permute.xlu1 %324 }
 0x2fc   :  { %v344_v1 = vmul.f32 %v325_v0, %v527_v5  ;;  %v345_v15 = vmul.f32 %v325_v0, %v529_v6 }
 0x2fe   :  { %360 = vst [vmem:[#allocation5 + $0x50] sm:$0xff] %v344_v1  ;;  %361 = vst [vmem:[#allocation5 + $0x58] sm:$0xff] %v345_v15 }
 0x2ff   :  { %v333_v20 = vpop.permute.xlu1 %332 }
 0x300   :  { %v348_v21 = vmul.f32 %v333_v20, %v553_v18  ;;  %v349_v12 = vmul.f32 %v333_v20, %v555_v19 }
 0x302   :  { %364 = vst [vmem:[#allocation5 + $0x70] sm:$0xff] %v348_v21  ;;  %365 = vst [vmem:[#allocation5 + $0x78] sm:$0xff] %v349_v12 }
 0x303   :  { %460 = shalt.err (!%p457_p12)
}
 0x304   :  { %s461_s11 = scalar_lea.hbm %s614_s3, 2048 }
 0x305   :  { %p462_p13 = scmp.ne.s32.totalorder %s614_s3, %s461_s11  ;;  %p465_p0 = scmp.lt.u32.totalorder %s461_s11, %s614_s3 }
 0x307   :  { %p467_p1 = pnand %p465_p0, %p462_p13 }
 0x309   :  { %470 = shalt.err (!%p467_p1)
}
 0x30a   :  { %377 = dma.vmem_to_hbm [thread:$0]  %s372_s7, 2048, %s614_s3, [#allocation4], %s476_s22, %s476_s22, %s477_s23  }
 0x30b   :  { %473 = dma.done.wait [#allocation4], 2048  }
 0x30c   :  { %474 = vsyncadd [#allocation4], 4294965248 }
 0x30d   :  { %381 = vsyncpa [#allocation3], 1 }
 0x30e   :  { %382 = vsyncpa [#allocation4], 1 }

</bundles_post_ra>
